<compile_context>
chip_gen: v6e
topology: v6e:2x2x1
jax: 0.10.0
libtpu: 0.0.40
codegen_flags: <defaults>
</compile_context>

<pallas_src>
import functools

import jax
import jax.numpy as jnp
from jax import lax
from jax.experimental import pallas as pl
from jax.experimental.pallas import tpu as pltpu


def _round_up(x, m):
    return ((x + m - 1) // m) * m


# ----------------------------- Pallas kernel --------------------------------
def _conv_gemm_kernel(p_ref, w_ref, b_ref, o_ref, acc_ref):
    """Grid = (G, N, M_tiles, OC_tiles, K_tiles); K (reduction) is innermost.

    p_ref:   (TM, TK)  im2col rows for this (group, image, m, k) tile
    w_ref:   (TK, TN)  reshaped conv-weight tile
    b_ref:   (1,  TN)  bias row for this OC tile
    o_ref:   (TN, TM)  output tile (written transposed -> NCHW layout directly)
    acc_ref: (TM, TN)  float32 accumulator scratch
    """
    k = pl.program_id(4)

    @pl.when(k == 0)
    def _init():
        acc_ref[...] = jnp.zeros_like(acc_ref)

    acc_ref[...] += jnp.dot(p_ref[...], w_ref[...],
                            preferred_element_type=jnp.float32)

    @pl.when(k == pl.num_programs(4) - 1)
    def _finalize():
        res = acc_ref[...] + b_ref[...].astype(jnp.float32)   # (TM, TN)
        o_ref[...] = res.T.astype(o_ref.dtype)                 # (TN, TM)


def _grouped_conv_gemm(patches, w3d, b3d, out_dtype, *, tm, tn, tk,
                       flops, bytes_accessed):
    """patches: (G, N, Mp, Kp), w3d: (G, Kp, OCp), b3d: (G, 1, OCp)
       -> (N, G, OCp, Mp)."""
    g_dim, n_dim, m_pad, k_pad = patches.shape
    oc_pad = w3d.shape[-1]
    grid = (g_dim, n_dim, m_pad // tm, oc_pad // tn, k_pad // tk)

    in_itemsize = patches.dtype.itemsize
    out_itemsize = jnp.dtype(out_dtype).itemsize
    vmem_bytes = (2 * (tm * tk + tk * tn + tn) * in_itemsize   # dbl-buffered inputs
                  + 2 * tm * tn * out_itemsize                 # dbl-buffered output
                  + tm * tn * 4)                               # f32 accumulator
    vmem_limit = int(min(max(2 * vmem_bytes, 4 * 1024 * 1024), 48 * 1024 * 1024))

    return pl.pallas_call(
        _conv_gemm_kernel,
        out_shape=jax.ShapeDtypeStruct((n_dim, g_dim, oc_pad, m_pad), out_dtype),
        grid_spec=pltpu.PrefetchScalarGridSpec(
            num_scalar_prefetch=0,
            grid=grid,
            in_specs=[
                pl.BlockSpec((None, None, tm, tk),
                             lambda g, n, i, j, k: (g, n, i, k)),
                pl.BlockSpec((None, tk, tn),
                             lambda g, n, i, j, k: (g, k, j)),
                pl.BlockSpec((None, 1, tn),
                             lambda g, n, i, j, k: (g, 0, j)),
            ],
            out_specs=pl.BlockSpec((None, None, tn, tm),
                                   lambda g, n, i, j, k: (n, g, j, i)),
            scratch_shapes=[pltpu.VMEM((tm, tn), jnp.float32)],
        ),
        compiler_params=pltpu.CompilerParams(
            dimension_semantics=("parallel", "parallel", "parallel",
                                 "parallel", "arbitrary"),
            vmem_limit_bytes=vmem_limit,
        ),
        cost_estimate=pl.CostEstimate(
            flops=int(flops), transcendentals=0,
            bytes_accessed=int(bytes_accessed)),
    )(patches, w3d, b3d)


# ----------------------------- im2col glue ----------------------------------
def _im2col_nhwc(x_nhwc, kh, kw, stride, padding, dilation):
    """x_nhwc: (N, H, W, C) -> patches (N, OH*OW, KH*KW*C), plus (OH, OW)."""
    n, h, w, c = x_nhwc.shape
    xp = jnp.pad(x_nhwc, ((0, 0), (padding, padding), (padding, padding), (0, 0)))
    hp, wp = h + 2 * padding, w + 2 * padding
    oh = (hp - dilation * (kh - 1) - 1) // stride + 1
    ow = (wp - dilation * (kw - 1) - 1) // stride + 1

    cols = []
    for i in range(kh):
        for j in range(kw):
            cols.append(
                xp[:,
                   i * dilation: i * dilation + stride * (oh - 1) + 1: stride,
                   j * dilation: j * dilation + stride * (ow - 1) + 1: stride,
                   :])                                   # (N, OH, OW, C)
    patches = jnp.concatenate(cols, axis=-1)             # (N, OH, OW, KH*KW*C)
    return patches.reshape(n, oh * ow, kh * kw * c), oh, ow


# ----------------------------- public wrapper --------------------------------
@functools.partial(jax.jit,
                   static_argnames=("stride", "padding", "dilation", "groups",
                                    "tm", "tn", "tk", "use_bf16"))
def dense_conv_forward(x, weight, bias=None, *, stride=1, padding=0, dilation=1,
                       groups=1, tm=256, tn=256, tk=512, use_bf16=False):
    """Equivalent of omp_sparse dense_forward (i.e. F.conv2d).

    x:      (N, C, H, W)
    weight: (OC, C // groups, KH, KW)
    bias:   (OC,)  (or the module's zeros(1) placeholder / None for no bias)
    returns (N, OC, OH, OW)
    """
    n, c, _, _ = x.shape
    oc, cpg, kh, kw = weight.shape
    assert c == cpg * groups and oc % groups == 0
    ocg = oc // groups

    if bias is None:
        bias = jnp.zeros((oc,), x.dtype)
    bias = jnp.asarray(bias, x.dtype).reshape(-1)
    if bias.shape[0] != oc:  # module uses torch.zeros(1) when there is no bias
        bias = jnp.broadcast_to(bias[:1], (oc,))

    compute_dtype = jnp.bfloat16 if use_bf16 else x.dtype

    # NHWC once; groups become a leading grid axis of a single pallas_call.
    x_nhwc = jnp.transpose(x, (0, 2, 3, 1))
    p_list = []
    oh = ow = None
    for g in range(groups):
        pg, oh, ow = _im2col_nhwc(x_nhwc[..., g * cpg:(g + 1) * cpg],
                                  kh, kw, stride, padding, dilation)
        p_list.append(pg)
    patches = jnp.stack(p_list, axis=0) if groups > 1 else p_list[0][None]
    # patches: (G, N, OH*OW, K) with K = KH*KW*Cpg (kernel-pos outer, channel inner).

    k_dim = kh * kw * cpg
    ohw = oh * ow

    # Effective tiles: lane-dense (multiples of 128) but clamped to problem size.
    tm_eff = min(tm, _round_up(ohw, 128))
    tn_eff = min(tn, _round_up(ocg, 128))
    tk_eff = min(tk, _round_up(k_dim, 128))
    m_pad = _round_up(ohw, tm_eff)
    oc_pad = _round_up(ocg, tn_eff)
    k_pad = _round_up(k_dim, tk_eff)

    patches = jnp.pad(patches,
                      ((0, 0), (0, 0), (0, m_pad - ohw), (0, k_pad - k_dim)))
    patches = patches.astype(compute_dtype)

    # (G, OCg, Cpg, KH, KW) -> (G, KH, KW, Cpg, OCg) -> (G, K, OCg):
    # matches the (i, j)-outer / channel-inner order of the im2col columns.
    w3d = weight.reshape(groups, ocg, cpg, kh, kw)
    w3d = jnp.transpose(w3d, (0, 3, 4, 2, 1)).reshape(groups, k_dim, ocg)
    w3d = jnp.pad(w3d, ((0, 0), (0, k_pad - k_dim), (0, oc_pad - ocg)))
    w3d = w3d.astype(compute_dtype)

    b3d = bias.reshape(groups, 1, ocg)
    b3d = jnp.pad(b3d, ((0, 0), (0, 0), (0, oc_pad - ocg))).astype(compute_dtype)

    flops = 2 * groups * n * ohw * k_dim * ocg
    bytes_accessed = (patches.size * patches.dtype.itemsize
                      + w3d.size * w3d.dtype.itemsize
                      + n * oc * ohw * jnp.dtype(x.dtype).itemsize)

    out = _grouped_conv_gemm(patches, w3d, b3d, x.dtype,
                             tm=tm_eff, tn=tn_eff, tk=tk_eff,
                             flops=flops, bytes_accessed=bytes_accessed)
    # out: (N, G, OCp, Mp) — already channel-major; just slice off padding.
    out = out[:, :, :ocg, :ohw].reshape(n, oc, oh, ow)
    return out


# ----------------------------------- main ------------------------------------
def _reference(x, weight, bias, stride, padding, dilation, groups):
    oc = weight.shape[0]
    return lax.conv_general_dilated(
        x, weight,
        window_strides=(stride, stride),
        padding=[(padding, padding), (padding, padding)],
        rhs_dilation=(dilation, dilation),
        dimension_numbers=("NCHW", "OIHW", "NCHW"),
        feature_group_count=groups,
    ) + bias.reshape(1, oc, 1, 1)


if __name__ == "__main__":
    key = jax.random.PRNGKey(0)
    k_x, k_w, k_b, k_x2, k_w2, k_b2 = jax.random.split(key, 6)

    # --- test 1: the canonical small Conv2d-consistent shapes -----------------
    N, C, H, W = 2, 4, 16, 16
    OC, KH, KW = 8, 3, 3
    stride, padding, dilation, groups = 1, 1, 1, 1

    x = jax.random.normal(k_x, (N, C, H, W), dtype=jnp.float32)
    weight = jax.random.normal(k_w, (OC, C // groups, KH, KW), dtype=jnp.float32) * 0.1
    bias = jax.random.normal(k_b, (OC,), dtype=jnp.float32) * 0.1

    out = dense_conv_forward(x, weight, bias, stride=stride, padding=padding,
                             dilation=dilation, groups=groups)
    out = jax.block_until_ready(out)
    ref = _reference(x, weight, bias, stride, padding, dilation, groups)
    assert out.shape == (N, OC, 16, 16), out.shape
    assert jnp.allclose(out, ref, atol=2e-4, rtol=2e-4), \
        float(jnp.max(jnp.abs(out - ref)))

    # --- test 2: grouped + strided, odd spatial sizes (exercises padding) -----
    N2, C2, H2, W2 = 1, 4, 9, 9
    OC2, G2, S2, P2 = 6, 2, 2, 1
    x2 = jax.random.normal(k_x2, (N2, C2, H2, W2), dtype=jnp.float32)
    w2 = jax.random.normal(k_w2, (OC2, C2 // G2, 3, 3), dtype=jnp.float32) * 0.1
    b2 = jax.random.normal(k_b2, (OC2,), dtype=jnp.float32) * 0.1

    out2 = dense_conv_forward(x2, w2, b2, stride=S2, padding=P2,
                              dilation=1, groups=G2)
    out2 = jax.block_until_ready(out2)
    ref2 = _reference(x2, w2, b2, S2, P2, 1, G2)
    assert out2.shape == ref2.shape, (out2.shape, ref2.shape)
    assert jnp.allclose(out2, ref2, atol=2e-4, rtol=2e-4), \
        float(jnp.max(jnp.abs(out2 - ref2)))

    print("KERNEL_OK")
</pallas_src>

<mosaic_0001>
module attributes {stable_mosaic.version = 11 : i64} {
  func.func @_conv_gemm_kernel(%arg0: i32, %arg1: i32, %arg2: i32, %arg3: i32, %arg4: i32, %arg5: memref<1x1x256x128xf32, #tpu.memory_space<vmem>>, %arg6: memref<1x128x128xf32, #tpu.memory_space<vmem>>, %arg7: memref<1x1x128xf32, #tpu.memory_space<vmem>>, %arg8: memref<1x1x128x256xf32, #tpu.memory_space<vmem>>, %arg9: memref<256x128xf32, #tpu.memory_space<vmem>>) attributes {dimension_semantics = [#tpu.dimension_semantics<parallel>, #tpu.dimension_semantics<parallel>, #tpu.dimension_semantics<parallel>, #tpu.dimension_semantics<parallel>, #tpu.dimension_semantics<arbitrary>], iteration_bounds = array<i64: 1, 2, 1, 1, 1>, scalar_prefetch = 0 : i64, scratch_operands = 1 : i64, tpu.core_type = #tpu.core_type<tc>, window_params = [{transform_indices = @transform_0, window_bounds = array<i64: 1, 1, 256, 128>}, {transform_indices = @transform_1, window_bounds = array<i64: 1, 128, 128>}, {transform_indices = @transform_2, window_bounds = array<i64: 1, 1, 128>}, {transform_indices = @transform_3, window_bounds = array<i64: 1, 1, 128, 256>}]} {
    %c0_i32 = arith.constant 0 : i32
    %0 = arith.cmpi eq, %arg4, %c0_i32 : i32
    %1 = arith.extui %0 : i1 to i32
    %c0_i32_0 = arith.constant 0 : i32
    %2 = arith.cmpi ne, %1, %c0_i32_0 : i32
    scf.if %2 {
      %cst_13 = arith.constant 0.000000e+00 : f32
      %14 = vector.broadcast %cst_13 : f32 to vector<256x128xf32>
      %c0_14 = arith.constant 0 : index
      %c0_15 = arith.constant 0 : index
      %15 = vector.load %arg9[%c0_14, %c0_15] : memref<256x128xf32, #tpu.memory_space<vmem>>, vector<256x128xf32>
      tpu.vector_store %arg9[%c0_14, %c0_15], %14 {strides = array<i32>} : memref<256x128xf32, #tpu.memory_space<vmem>>, vector<256x128xf32>,
    } else {
    }
    %c0 = arith.constant 0 : index
    %c0_1 = arith.constant 0 : index
    %3 = vector.load %arg9[%c0, %c0_1] : memref<256x128xf32, #tpu.memory_space<vmem>>, vector<256x128xf32>
    %c0_2 = arith.constant 0 : index
    %c0_3 = arith.constant 0 : index
    %c0_4 = arith.constant 0 : index
    %c0_5 = arith.constant 0 : index
    %4 = vector.load %arg5[%c0_2, %c0_3, %c0_4, %c0_5] : memref<1x1x256x128xf32, #tpu.memory_space<vmem>>, vector<1x1x256x128xf32>
    %5 = vector.shape_cast %4 : vector<1x1x256x128xf32> to vector<256x128xf32>
    %c0_6 = arith.constant 0 : index
    %c0_7 = arith.constant 0 : index
    %c0_8 = arith.constant 0 : index
    %6 = vector.load %arg6[%c0_6, %c0_7, %c0_8] : memref<1x128x128xf32, #tpu.memory_space<vmem>>, vector<1x128x128xf32>
    %7 = vector.shape_cast %6 : vector<1x128x128xf32> to vector<128x128xf32>
    %cst = arith.constant dense<0.000000e+00> : vector<256x128xf32>
    %8 = tpu.matmul %5, %7, %cst {dimension_numbers = #tpu.dot_dimension_numbers<[1], [0], [0], [1], [0, 0, 1, 1], [], []>} : vector<256x128xf32>, vector<128x128xf32>, vector<256x128xf32> -> vector<256x128xf32>
    %9 = arith.addf %3, %8 : vector<256x128xf32>
    %c0_9 = arith.constant 0 : index
    %c0_10 = arith.constant 0 : index
    %10 = vector.load %arg9[%c0_9, %c0_10] : memref<256x128xf32, #tpu.memory_space<vmem>>, vector<256x128xf32>
    tpu.vector_store %arg9[%c0_9, %c0_10], %9 {strides = array<i32>} : memref<256x128xf32, #tpu.memory_space<vmem>>, vector<256x128xf32>,
    %c0_i32_11 = arith.constant 0 : i32
    %11 = arith.cmpi eq, %arg4, %c0_i32_11 : i32
    %12 = arith.extui %11 : i1 to i32
    %c0_i32_12 = arith.constant 0 : i32
    %13 = arith.cmpi ne, %12, %c0_i32_12 : i32
    scf.if %13 {
      %c0_13 = arith.constant 0 : index
      %c0_14 = arith.constant 0 : index
      %14 = vector.load %arg9[%c0_13, %c0_14] : memref<256x128xf32, #tpu.memory_space<vmem>>, vector<256x128xf32>
      %c0_15 = arith.constant 0 : index
      %c0_16 = arith.constant 0 : index
      %c0_17 = arith.constant 0 : index
      %15 = vector.load %arg7[%c0_15, %c0_16, %c0_17] : memref<1x1x128xf32, #tpu.memory_space<vmem>>, vector<1x1x128xf32>
      %16 = vector.shape_cast %15 : vector<1x1x128xf32> to vector<1x128xf32>
      %17 = vector.broadcast %16 : vector<1x128xf32> to vector<256x128xf32>
      %18 = arith.addf %14, %17 : vector<256x128xf32>
      %19 = tpu.transpose %18, [1, 0] : vector<256x128xf32> -> vector<128x256xf32>
      %c0_18 = arith.constant 0 : index
      %c0_19 = arith.constant 0 : index
      %c0_20 = arith.constant 0 : index
      %c0_21 = arith.constant 0 : index
      %20 = vector.load %arg8[%c0_18, %c0_19, %c0_20, %c0_21] : memref<1x1x128x256xf32, #tpu.memory_space<vmem>>, vector<1x1x128x256xf32>
      %21 = vector.shape_cast %20 : vector<1x1x128x256xf32> to vector<128x256xf32>
      %22 = vector.shape_cast %19 : vector<128x256xf32> to vector<1x1x128x256xf32>
      tpu.vector_store %arg8[%c0_18, %c0_19, %c0_20, %c0_21], %22 {strides = array<i32>} : memref<1x1x128x256xf32, #tpu.memory_space<vmem>>, vector<1x1x128x256xf32>,
    } else {
    }
    return
  }
  func.func @transform_0(%arg0: i32, %arg1: i32, %arg2: i32, %arg3: i32, %arg4: i32) -> (i32, i32, i32, i32) {
    %c0_i32 = arith.constant 0 : i32
    return %arg0, %arg1, %arg2, %arg4 : i32, i32, i32, i32
  }
  func.func @transform_1(%arg0: i32, %arg1: i32, %arg2: i32, %arg3: i32, %arg4: i32) -> (i32, i32, i32) {
    %c0_i32 = arith.constant 0 : i32
    return %arg0, %arg4, %arg3 : i32, i32, i32
  }
  func.func @transform_2(%arg0: i32, %arg1: i32, %arg2: i32, %arg3: i32, %arg4: i32) -> (i32, i32, i32) {
    %c0_i32 = arith.constant 0 : i32
    %c0_i32_0 = arith.constant 0 : i32
    return %arg0, %c0_i32, %arg3 : i32, i32, i32
  }
  func.func @transform_3(%arg0: i32, %arg1: i32, %arg2: i32, %arg3: i32, %arg4: i32) -> (i32, i32, i32, i32) {
    %c0_i32 = arith.constant 0 : i32
    return %arg1, %arg0, %arg3, %arg2 : i32, i32, i32, i32
  }
}

</mosaic_0001>

<bundles_post_ra>
// kernel: dense_conv_forward.1
= control target key start
LH: loop header
LB: loop body
LE: loop exit
PB: predicated region body
PF: predicated region fallthrough
CT: control target
= control target key end

     0   :  { %s1349_s12 = smov 0   ;;  %s1351_s13 = smov 0   ;;  %s1546_s0 = inlined_call_operand.vmem [shape: f32[1,2,256,128], index: 0, kind: input, shape index: {}]   ;;  %s1547_s1 = inlined_call_operand.vmem [shape: f32[1,128,128], index: 1, kind: input, shape index: {}]   ;;  %s1548_s2 = inlined_call_operand.vmem [shape: f32[1,1,128], index: 2, kind: input, shape index: {}]   ;;  %s1549_s3 = inlined_call_operand.vmem [shape: f32[2,1,128,256], index: 3, kind: output, shape index: {}]  }
   0x1   :  { %s1353_s14 = smov 0  }
   0x2 LB: > { %s42_s15 = sadd.s32 1, %s1323_s13  ;;  %p1111_p0 = scmp.ge.s32.totalorder %s1327_s14, 1  ;;  %s1327_s14 = sphi %s1353_s14, %s13_s14   ;;  %s1323_s13 = sphi %s1351_s13, %s1551_s13   ;;  %s1319_s12 = sphi %s1349_s12, %s1550_s12  }
   0x3   : > { %p44_p1 = scmp.ge.s32.totalorder %s42_s15, 2  ;;  %p229_p2 = scmp.lt.s32.totalorder %s1327_s14, 3 }
   0x5   : > { %s1553_s15 = smov (%p44_p1, %s42_s15), 0  ;;  %p230_p3 = pnand %p1111_p0, %p229_p2 }
   0x6   : > { %p298_p4 = scmp.lt.s32.totalorder (!%p230_p3), %s1319_s12, 1 }
   0x7   : > { %233 = sbr.rel (%p230_p3) target bundleno = 429 (0x1ad), region = 32 }
   0xc   : > { %v466_v0 = vld [vmem:[%s1547_s1 + $0x78] sm:$0xff]  ;;  %v465_v1 = vld [vmem:[%s1547_s1 + $0x70] sm:$0xff]  ;;  %v464_v2 = vld [vmem:[%s1547_s1 + $0x68] sm:$0xff]  ;;  %s1555_s12 = smov (!%p298_p4, %s1319_s12), 1 }
   0xd   : > { %1169 = vmatprep.subr.mxu0 %v466_v0  ;;  %1249 = vmatprep.subr.mxu1 %v466_v0  ;;  %v463_v3 = vld [vmem:[%s1547_s1 + $0x60] sm:$0xff]  ;;  %v462_v4 = vld [vmem:[%s1547_s1 + $0x58] sm:$0xff]  ;;  %v461_v5 = vld [vmem:[%s1547_s1 + $0x50] sm:$0xff]  ;;  %s1119_s21 = sshll.u32 %s1555_s12, 8 }
   0xe   : > { %1170 = vmatpush3.msra.mxu0 %v466_v0  ;;  %1265 = vmatpush3.msra.mxu1 %v466_v0  ;;  %v460_v6 = vld [vmem:[%s1547_s1 + $0x48] sm:$0xff]  ;;  %v459_v7 = vld [vmem:[%s1547_s1 + $0x40] sm:$0xff]  ;;  %v458_v8 = vld [vmem:[%s1547_s1 + $0x38] sm:$0xff]  ;;  %s1424_s26 = scalar_lea.vmem %s1546_s0, %s1119_s21  ;;  %s1503_s6 = scalar_lea.vmem %s1549_s3, %s1119_s21 }
   0xf   : > { %1171 = vmatprep.subr.mxu0 %v465_v1  ;;  %1250 = vmatprep.subr.mxu1 %v465_v1  ;;  %v457_v9 = vld [vmem:[%s1547_s1 + $0x30] sm:$0xff]  ;;  %v456_v10 = vld [vmem:[%s1547_s1 + $0x28] sm:$0xff]  ;;  %v455_v11 = vld [vmem:[%s1547_s1 + $0x20] sm:$0xff] }
  0x10   : > { %1172 = vmatpush3.msra.mxu0 %v465_v1  ;;  %1266 = vmatpush3.msra.mxu1 %v465_v1  ;;  %v454_v12 = vld [vmem:[%s1547_s1 + $0x18] sm:$0xff]  ;;  %v453_v13 = vld [vmem:[%s1547_s1 + $0x10] sm:$0xff]  ;;  %v452_v14 = vld [vmem:[%s1547_s1 + $0x8] sm:$0xff] }
  0x11   : > { %1173 = vmatprep.subr.mxu0 %v464_v2  ;;  %1251 = vmatprep.subr.mxu1 %v464_v2  ;;  %v451_v15 = vld [vmem:[%s1547_s1] sm:$0xff]  ;;  %v420_v18 = vld [vmem:[%s1424_s26 + $0x8] sm:$0xff]  ;;  %v421_v20 = vld [vmem:[%s1424_s26 + $0x10] sm:$0xff] }
  0x12   : > { %1174 = vmatpush3.msra.mxu0 %v464_v2  ;;  %1267 = vmatpush3.msra.mxu1 %v464_v2  ;;  %v419_v16 = vld [vmem:[%s1424_s26] sm:$0xff]  ;;  %v436_v19 = vld [vmem:[%s1424_s26 + $0x88] sm:$0xff]  ;;  %v437_v21 = vld [vmem:[%s1424_s26 + $0x90] sm:$0xff] }
  0x13   : > { %1175 = vmatprep.subr.mxu0 %v463_v3  ;;  %1252 = vmatprep.subr.mxu1 %v463_v3  ;;  %v435_v17 = vld [vmem:[%s1424_s26 + $0x80] sm:$0xff]  ;;  %v422_v22 = vld [vmem:[%s1424_s26 + $0x18] sm:$0xff]  ;;  %v424_v26 = vld [vmem:[%s1424_s26 + $0x28] sm:$0xff] }
  0x14   : > { %1176 = vmatpush3.msra.mxu0 %v463_v3  ;;  %1268 = vmatpush3.msra.mxu1 %v463_v3  ;;  %v438_v23 = vld [vmem:[%s1424_s26 + $0x98] sm:$0xff]  ;;  %v423_v24 = vld [vmem:[%s1424_s26 + $0x20] sm:$0xff]  ;;  %v440_v27 = vld [vmem:[%s1424_s26 + $0xa8] sm:$0xff] }
  0x15   : > { %1177 = vmatprep.subr.mxu0 %v462_v4  ;;  %1253 = vmatprep.subr.mxu1 %v462_v4  ;;  %v439_v25 = vld [vmem:[%s1424_s26 + $0xa0] sm:$0xff]  ;;  %v425_v28 = vld [vmem:[%s1424_s26 + $0x30] sm:$0xff]  ;;  %v426_v30 = vld [vmem:[%s1424_s26 + $0x38] sm:$0xff] }
  0x16   : > { %1178 = vmatpush3.msra.mxu0 %v462_v4  ;;  %1269 = vmatpush3.msra.mxu1 %v462_v4  ;;  %v441_v29 = vld [vmem:[%s1424_s26 + $0xb0] sm:$0xff]  ;;  %v442_v31 = vld [vmem:[%s1424_s26 + $0xb8] sm:$0xff]  ;;  %v427_v32 = vld [vmem:[%s1424_s26 + $0x40] sm:$0xff] }
  0x17   : > { %1179 = vmatprep.subr.mxu0 %v461_v5  ;;  %1254 = vmatprep.subr.mxu1 %v461_v5  ;;  %v443_v33 = vld [vmem:[%s1424_s26 + $0xc0] sm:$0xff]  ;;  %v428_v34 = vld [vmem:[%s1424_s26 + $0x48] sm:$0xff]  ;;  %v429_v36 = vld [vmem:[%s1424_s26 + $0x50] sm:$0xff] }
  0x18   : > { %1180 = vmatpush3.msra.mxu0 %v461_v5  ;;  %1270 = vmatpush3.msra.mxu1 %v461_v5  ;;  %v444_v35 = vld [vmem:[%s1424_s26 + $0xc8] sm:$0xff]  ;;  %v445_v37 = vld [vmem:[%s1424_s26 + $0xd0] sm:$0xff]  ;;  %v430_v38 = vld [vmem:[%s1424_s26 + $0x58] sm:$0xff] }
  0x19   : > { %1181 = vmatprep.subr.mxu0 %v460_v6  ;;  %1255 = vmatprep.subr.mxu1 %v460_v6  ;;  %v446_v39 = vld [vmem:[%s1424_s26 + $0xd8] sm:$0xff]  ;;  %v431_v40 = vld [vmem:[%s1424_s26 + $0x60] sm:$0xff]  ;;  %v432_v42 = vld [vmem:[%s1424_s26 + $0x68] sm:$0xff] }
  0x1a   : > { %1182 = vmatpush3.msra.mxu0 %v460_v6  ;;  %1271 = vmatpush3.msra.mxu1 %v460_v6  ;;  %v447_v41 = vld [vmem:[%s1424_s26 + $0xe0] sm:$0xff]  ;;  %v448_v43 = vld [vmem:[%s1424_s26 + $0xe8] sm:$0xff]  ;;  %v433_v44 = vld [vmem:[%s1424_s26 + $0x70] sm:$0xff] }
  0x1b   : > { %1183 = vmatprep.subr.mxu0 %v459_v7  ;;  %1256 = vmatprep.subr.mxu1 %v459_v7  ;;  %v449_v45 = vld [vmem:[%s1424_s26 + $0xf0] sm:$0xff]  ;;  %v434_v46 = vld [vmem:[%s1424_s26 + $0x78] sm:$0xff]  ;;  %v1464_v50 = vld [vmem:[%s1548_s2] ss:$0 sm:$0xff] }
  0x1c   : > { %1184 = vmatpush3.msra.mxu0 %v459_v7  ;;  %1272 = vmatpush3.msra.mxu1 %v459_v7  ;;  %v450_v47 = vld [vmem:[%s1424_s26 + $0xf8] sm:$0xff] }
  0x1d   : > { %1185 = vmatprep.subr.mxu0 %v458_v8  ;;  %1257 = vmatprep.subr.mxu1 %v458_v8 }
  0x1e   : > { %1186 = vmatpush3.msra.mxu0 %v458_v8  ;;  %1273 = vmatpush3.msra.mxu1 %v458_v8 }
  0x1f   : > { %1187 = vmatprep.subr.mxu0 %v457_v9  ;;  %1258 = vmatprep.subr.mxu1 %v457_v9 }
  0x20   : > { %1188 = vmatpush3.msra.mxu0 %v457_v9  ;;  %1274 = vmatpush3.msra.mxu1 %v457_v9 }
  0x21   : > { %1189 = vmatprep.subr.mxu0 %v456_v10  ;;  %1259 = vmatprep.subr.mxu1 %v456_v10 }
  0x22   : > { %1190 = vmatpush3.msra.mxu0 %v456_v10  ;;  %1275 = vmatpush3.msra.mxu1 %v456_v10 }
  0x23   : > { %1191 = vmatprep.subr.mxu0 %v455_v11  ;;  %1260 = vmatprep.subr.mxu1 %v455_v11 }
  0x24   : > { %1192 = vmatpush3.msra.mxu0 %v455_v11  ;;  %1276 = vmatpush3.msra.mxu1 %v455_v11 }
  0x25   : > { %1193 = vmatprep.subr.mxu0 %v454_v12  ;;  %1261 = vmatprep.subr.mxu1 %v454_v12 }
  0x26   : > { %1194 = vmatpush3.msra.mxu0 %v454_v12  ;;  %1277 = vmatpush3.msra.mxu1 %v454_v12 }
  0x27   : > { %1195 = vmatprep.subr.mxu0 %v453_v13  ;;  %1262 = vmatprep.subr.mxu1 %v453_v13 }
  0x28   : > { %1196 = vmatpush3.msra.mxu0 %v453_v13  ;;  %1278 = vmatpush3.msra.mxu1 %v453_v13 }
  0x29   : > { %1197 = vmatprep.subr.mxu0 %v452_v14  ;;  %1263 = vmatprep.subr.mxu1 %v452_v14 }
  0x2a   : > { %1198 = vmatpush3.msra.mxu0 %v452_v14  ;;  %1279 = vmatpush3.msra.mxu1 %v452_v14 }
  0x2b   : > { %1199 = vmatprep.subr.mxu0 %v451_v15  ;;  %1264 = vmatprep.subr.mxu1 %v451_v15 }
  0x2c   : > { %1200 = vmatpush3.msra.mxu0 %v451_v15  ;;  %1280 = vmatpush3.msra.mxu1 %v451_v15 }
  0x2d   : > { %1201 = vmatprep.mubr.f32.mxu0 %v419_v16  ;;  %1225 = vmatprep.mubr.f32.mxu1 %v435_v17 }
  0x2e   : > { %1202 = vmatmul.mubr.f32.vlgmr.msra.gmra.mxu0 %v420_v18  ;;  %1226 = vmatmul.mubr.f32.vlgmr.msra.gmra.mxu1 %v436_v19 }
  0x2f   : > { %1204 = vmatprep.mubr.f32.mxu0 %v421_v20  ;;  %1228 = vmatprep.mubr.f32.mxu1 %v437_v21 }
  0x32   : > { %1205 = vmatmul.mubr.f32.gmra.mxu0 %v422_v22  ;;  %1229 = vmatmul.mubr.f32.gmra.mxu1 %v438_v23 }
  0x33   : > { %1207 = vmatprep.mubr.f32.mxu0 %v423_v24  ;;  %1231 = vmatprep.mubr.f32.mxu1 %v439_v25 }
  0x36   : > { %1208 = vmatmul.mubr.f32.gmra.mxu0 %v424_v26  ;;  %1232 = vmatmul.mubr.f32.gmra.mxu1 %v440_v27 }
  0x37   : > { %1210 = vmatprep.mubr.f32.mxu0 %v425_v28  ;;  %1234 = vmatprep.mubr.f32.mxu1 %v441_v29 }
  0x3a   : > { %1211 = vmatmul.mubr.f32.gmra.mxu0 %v426_v30  ;;  %1235 = vmatmul.mubr.f32.gmra.mxu1 %v442_v31 }
  0x3b   : > { %1213 = vmatprep.mubr.f32.mxu0 %v427_v32  ;;  %1237 = vmatprep.mubr.f32.mxu1 %v443_v33 }
  0x3e   : > { %1214 = vmatmul.mubr.f32.gmra.mxu0 %v428_v34  ;;  %1238 = vmatmul.mubr.f32.gmra.mxu1 %v444_v35 }
  0x3f   : > { %1216 = vmatprep.mubr.f32.mxu0 %v429_v36  ;;  %1240 = vmatprep.mubr.f32.mxu1 %v445_v37 }
  0x42   : > { %1217 = vmatmul.mubr.f32.gmra.mxu0 %v430_v38  ;;  %1241 = vmatmul.mubr.f32.gmra.mxu1 %v446_v39 }
  0x43   : > { %1219 = vmatprep.mubr.f32.mxu0 %v431_v40  ;;  %1243 = vmatprep.mubr.f32.mxu1 %v447_v41 }
  0x46   : > { %1220 = vmatmul.mubr.f32.gmra.mxu0 %v432_v42  ;;  %1244 = vmatmul.mubr.f32.gmra.mxu1 %v448_v43 }
  0x47   : > { %1222 = vmatprep.mubr.f32.mxu0 %v433_v44  ;;  %1246 = vmatprep.mubr.f32.mxu1 %v449_v45 }
  0x4a   : > { %1223 = vmatmul.mubr.f32.gmra.mxu0 %v434_v46  ;;  %1247 = vmatmul.mubr.f32.gmra.mxu1 %v450_v47 }
  0xee   : > { %v1203_v48 = vpop.f32.mrf.mxu0  ;;  %v1227_v49 = vpop.f32.mrf.mxu1 }
  0xef   : > { %v799_v57 = vadd.f32 %v1203_v48, %v1464_v50  ;;  %v815_v58 = vadd.f32 %v1227_v49, %v1464_v50 }
  0xf0   : > { %v533_v51 = vpop.f32.mrf.mxu0  ;;  %v613_v52 = vpop.f32.mrf.mxu1 }
  0xf1   : > { %v814_v53 = vadd.f32 %v1464_v50, %v613_v52  ;;  %v798_v54 = vadd.f32 %v1464_v50, %v533_v51 }
  0xf2   : > { %v1206_v55 = vpop.f32.mrf.mxu0  ;;  %v1230_v56 = vpop.f32.mrf.mxu1 }
  0xf3   : > { %862 = vxpose.xlu1.b32.start [1/16] %v814_v53, 128  ;;  %830 = vxpose.xlu0.b32.start [1/16] %v798_v54, 128  ;;  %v801_v1 = vadd.f32 %v1206_v55, %v1464_v50  ;;  %v817_v2 = vadd.f32 %v1230_v56, %v1464_v50 }
  0xf4   : > { %v543_v59 = vpop.f32.mrf.mxu0  ;;  %v623_v60 = vpop.f32.mrf.mxu1 }
  0xf5   : > { %v800_v61 = vadd.f32 %v1464_v50, %v543_v59  ;;  %v816_v62 = vadd.f32 %v1464_v50, %v623_v60 }
  0xf6   : > { %v1209_v63 = vpop.f32.mrf.mxu0  ;;  %v1233_v0 = vpop.f32.mrf.mxu1 }
  0xf7   : > { %863 = vxpose.xlu1.b32.cont [2/16] %v815_v58, 128  ;;  %831 = vxpose.xlu0.b32.cont [2/16] %v799_v57, 128  ;;  %v803_v9 = vadd.f32 %v1209_v63, %v1464_v50  ;;  %v819_v10 = vadd.f32 %v1233_v0, %v1464_v50 }
  0xf8   : > { %v553_v3 = vpop.f32.mrf.mxu0  ;;  %v633_v4 = vpop.f32.mrf.mxu1 }
  0xf9   : > { %v802_v5 = vadd.f32 %v1464_v50, %v553_v3  ;;  %v818_v6 = vadd.f32 %v1464_v50, %v633_v4 }
  0xfa   : > { %v1212_v7 = vpop.f32.mrf.mxu0  ;;  %v1236_v8 = vpop.f32.mrf.mxu1 }
  0xfb   : > { %864 = vxpose.xlu1.b32.cont [3/16] %v816_v62, 128  ;;  %832 = vxpose.xlu0.b32.cont [3/16] %v800_v61, 128  ;;  %v805_v17 = vadd.f32 %v1212_v7, %v1464_v50  ;;  %v821_v18 = vadd.f32 %v1236_v8, %v1464_v50 }
  0xfc   : > { %v563_v11 = vpop.f32.mrf.mxu0  ;;  %v643_v12 = vpop.f32.mrf.mxu1 }
  0xfd   : > { %v804_v13 = vadd.f32 %v1464_v50, %v563_v11  ;;  %v820_v14 = vadd.f32 %v1464_v50, %v643_v12 }
  0xfe   : > { %v1215_v15 = vpop.f32.mrf.mxu0  ;;  %v1239_v16 = vpop.f32.mrf.mxu1 }
  0xff   : > { %865 = vxpose.xlu1.b32.cont [4/16] %v817_v2, 128  ;;  %833 = vxpose.xlu0.b32.cont [4/16] %v801_v1, 128  ;;  %v807_v25 = vadd.f32 %v1215_v15, %v1464_v50  ;;  %v823_v26 = vadd.f32 %v1239_v16, %v1464_v50 }
 0x100   : > { %v573_v19 = vpop.f32.mrf.mxu0  ;;  %v653_v20 = vpop.f32.mrf.mxu1 }
 0x101   : > { %v806_v21 = vadd.f32 %v1464_v50, %v573_v19  ;;  %v822_v22 = vadd.f32 %v1464_v50, %v653_v20 }
 0x102   : > { %v1218_v23 = vpop.f32.mrf.mxu0  ;;  %v1242_v24 = vpop.f32.mrf.mxu1 }
 0x103   : > { %866 = vxpose.xlu1.b32.cont [5/16] %v818_v6, 128  ;;  %834 = vxpose.xlu0.b32.cont [5/16] %v802_v5, 128  ;;  %v809_v33 = vadd.f32 %v1218_v23, %v1464_v50  ;;  %v825_v34 = vadd.f32 %v1242_v24, %v1464_v50 }
 0x104   : > { %v583_v27 = vpop.f32.mrf.mxu0  ;;  %v663_v28 = vpop.f32.mrf.mxu1 }
 0x105   : > { %v808_v29 = vadd.f32 %v1464_v50, %v583_v27  ;;  %v824_v30 = vadd.f32 %v1464_v50, %v663_v28 }
 0x106   : > { %v1221_v31 = vpop.f32.mrf.mxu0  ;;  %v1245_v32 = vpop.f32.mrf.mxu1 }
 0x107   : > { %867 = vxpose.xlu1.b32.cont [6/16] %v819_v10, 128  ;;  %835 = vxpose.xlu0.b32.cont [6/16] %v803_v9, 128  ;;  %v811_v41 = vadd.f32 %v1221_v31, %v1464_v50  ;;  %v827_v42 = vadd.f32 %v1245_v32, %v1464_v50 }
 0x108   : > { %v593_v35 = vpop.f32.mrf.mxu0  ;;  %v673_v36 = vpop.f32.mrf.mxu1 }
 0x109   : > { %v810_v37 = vadd.f32 %v1464_v50, %v593_v35  ;;  %v826_v38 = vadd.f32 %v1464_v50, %v673_v36 }
 0x10a   : > { %v1224_v39 = vpop.f32.mrf.mxu0  ;;  %v1248_v40 = vpop.f32.mrf.mxu1 }
 0x10b   : > { %868 = vxpose.xlu1.b32.cont [7/16] %v820_v14, 128  ;;  %836 = vxpose.xlu0.b32.cont [7/16] %v804_v13, 128  ;;  %v813_v47 = vadd.f32 %v1224_v39, %v1464_v50  ;;  %v829_v48 = vadd.f32 %v1248_v40, %v1464_v50 }
 0x10c   : > { %v603_v43 = vpop.f32.mrf.mxu0  ;;  %v683_v44 = vpop.f32.mrf.mxu1 }
 0x10d   : > { %v812_v45 = vadd.f32 %v1464_v50, %v603_v43  ;;  %v828_v46 = vadd.f32 %v1464_v50, %v683_v44 }
 0x10f   : > { %869 = vxpose.xlu1.b32.cont [8/16] %v821_v18, 128  ;;  %837 = vxpose.xlu0.b32.cont [8/16] %v805_v17, 128 }
 0x113   : > { %870 = vxpose.xlu1.b32.cont [9/16] %v822_v22, 128  ;;  %838 = vxpose.xlu0.b32.cont [9/16] %v806_v21, 128 }
 0x117   : > { %871 = vxpose.xlu1.b32.cont [10/16] %v823_v26, 128  ;;  %839 = vxpose.xlu0.b32.cont [10/16] %v807_v25, 128 }
 0x11b   : > { %872 = vxpose.xlu1.b32.cont [11/16] %v824_v30, 128  ;;  %840 = vxpose.xlu0.b32.cont [11/16] %v808_v29, 128 }
 0x11f   : > { %873 = vxpose.xlu1.b32.cont [12/16] %v825_v34, 128  ;;  %841 = vxpose.xlu0.b32.cont [12/16] %v809_v33, 128 }
 0x123   : > { %874 = vxpose.xlu1.b32.cont [13/16] %v826_v38, 128  ;;  %842 = vxpose.xlu0.b32.cont [13/16] %v810_v37, 128 }
 0x127   : > { %875 = vxpose.xlu1.b32.cont [14/16] %v827_v42, 128  ;;  %843 = vxpose.xlu0.b32.cont [14/16] %v811_v41, 128 }
 0x12b   : > { %876 = vxpose.xlu1.b32.cont [15/16] %v828_v46, 128  ;;  %844 = vxpose.xlu0.b32.cont [15/16] %v812_v45, 128 }
 0x12f   : > { %877 = vxpose.xlu1.b32.end [16/16] %v829_v48, 128  ;;  %845 = vxpose.xlu0.b32.end [16/16] %v813_v47, 128 }
 0x16f   : > { %v878_v49 = vpop.trf.xlu1  ;;  %v846_v51 = vpop.trf.xlu0 }
 0x170   : > { %895 = vst [vmem:[%s1503_s6 + $0x8] sm:$0xff] %v878_v49  ;;  %894 = vst [vmem:[%s1503_s6] sm:$0xff] %v846_v51 }
 0x173   : > { %v879_v50 = vpop.trf.xlu1  ;;  %v847_v52 = vpop.trf.xlu0 }
 0x174   : > { %897 = vst [vmem:[%s1503_s6 + $0x18] sm:$0xff] %v879_v50  ;;  %896 = vst [vmem:[%s1503_s6 + $0x10] sm:$0xff] %v847_v52 }
 0x177   : > { %v880_v53 = vpop.trf.xlu1  ;;  %v848_v54 = vpop.trf.xlu0 }
 0x178   : > { %899 = vst [vmem:[%s1503_s6 + $0x28] sm:$0xff] %v880_v53  ;;  %898 = vst [vmem:[%s1503_s6 + $0x20] sm:$0xff] %v848_v54 }
 0x17b   : > { %v881_v55 = vpop.trf.xlu1  ;;  %v849_v56 = vpop.trf.xlu0 }
 0x17c   : > { %901 = vst [vmem:[%s1503_s6 + $0x38] sm:$0xff] %v881_v55  ;;  %900 = vst [vmem:[%s1503_s6 + $0x30] sm:$0xff] %v849_v56 }
 0x17f   : > { %v882_v57 = vpop.trf.xlu1  ;;  %v850_v58 = vpop.trf.xlu0 }
 0x180   : > { %903 = vst [vmem:[%s1503_s6 + $0x48] sm:$0xff] %v882_v57  ;;  %902 = vst [vmem:[%s1503_s6 + $0x40] sm:$0xff] %v850_v58 }
 0x183   : > { %v883_v59 = vpop.trf.xlu1  ;;  %v851_v60 = vpop.trf.xlu0 }
 0x184   : > { %905 = vst [vmem:[%s1503_s6 + $0x58] sm:$0xff] %v883_v59  ;;  %904 = vst [vmem:[%s1503_s6 + $0x50] sm:$0xff] %v851_v60 }
 0x187   : > { %v884_v61 = vpop.trf.xlu1  ;;  %v852_v62 = vpop.trf.xlu0 }
 0x188   : > { %907 = vst [vmem:[%s1503_s6 + $0x68] sm:$0xff] %v884_v61  ;;  %906 = vst [vmem:[%s1503_s6 + $0x60] sm:$0xff] %v852_v62 }
 0x18b   : > { %v885_v63 = vpop.trf.xlu1  ;;  %v853_v0 = vpop.trf.xlu0 }
 0x18c   : > { %909 = vst [vmem:[%s1503_s6 + $0x78] sm:$0xff] %v885_v63  ;;  %908 = vst [vmem:[%s1503_s6 + $0x70] sm:$0xff] %v853_v0 }
 0x18f   : > { %v886_v1 = vpop.trf.xlu1  ;;  %v854_v2 = vpop.trf.xlu0 }
 0x190   : > { %911 = vst [vmem:[%s1503_s6 + $0x88] sm:$0xff] %v886_v1  ;;  %910 = vst [vmem:[%s1503_s6 + $0x80] sm:$0xff] %v854_v2 }
 0x193   : > { %v887_v3 = vpop.trf.xlu1  ;;  %v855_v4 = vpop.trf.xlu0 }
 0x194   : > { %913 = vst [vmem:[%s1503_s6 + $0x98] sm:$0xff] %v887_v3  ;;  %912 = vst [vmem:[%s1503_s6 + $0x90] sm:$0xff] %v855_v4 }
 0x197   : > { %v888_v5 = vpop.trf.xlu1  ;;  %v856_v6 = vpop.trf.xlu0 }
 0x198   : > { %915 = vst [vmem:[%s1503_s6 + $0xa8] sm:$0xff] %v888_v5  ;;  %914 = vst [vmem:[%s1503_s6 + $0xa0] sm:$0xff] %v856_v6 }
 0x19b   : > { %v889_v7 = vpop.trf.xlu1  ;;  %v857_v8 = vpop.trf.xlu0 }
 0x19c   : > { %917 = vst [vmem:[%s1503_s6 + $0xb8] sm:$0xff] %v889_v7  ;;  %916 = vst [vmem:[%s1503_s6 + $0xb0] sm:$0xff] %v857_v8 }
 0x19f   : > { %v890_v9 = vpop.trf.xlu1  ;;  %v858_v10 = vpop.trf.xlu0 }
 0x1a0   : > { %919 = vst [vmem:[%s1503_s6 + $0xc8] sm:$0xff] %v890_v9  ;;  %918 = vst [vmem:[%s1503_s6 + $0xc0] sm:$0xff] %v858_v10 }
 0x1a3   : > { %v891_v11 = vpop.trf.xlu1  ;;  %v859_v12 = vpop.trf.xlu0 }
 0x1a4   : > { %921 = vst [vmem:[%s1503_s6 + $0xd8] sm:$0xff] %v891_v11  ;;  %920 = vst [vmem:[%s1503_s6 + $0xd0] sm:$0xff] %v859_v12 }
 0x1a7   : > { %v892_v13 = vpop.trf.xlu1  ;;  %v860_v14 = vpop.trf.xlu0 }
 0x1a8   : > { %923 = vst [vmem:[%s1503_s6 + $0xe8] sm:$0xff] %v892_v13  ;;  %922 = vst [vmem:[%s1503_s6 + $0xe0] sm:$0xff] %v860_v14 }
 0x1ab   : > { %v893_v15 = vpop.trf.xlu1  ;;  %v861_v16 = vpop.trf.xlu0 }
 0x1ac   : > { %925 = vst [vmem:[%s1503_s6 + $0xf8] sm:$0xff] %v893_v15  ;;  %924 = vst [vmem:[%s1503_s6 + $0xf0] sm:$0xff] %v861_v16 }
 0x1ad PF: > { %s13_s14 = sadd.s32 1, %s1327_s14   ;;  %s1550_s12 = smov %s1323_s13 }
 0x1ae   : > { %p10_p5 = scmp.ge.s32.totalorder %s13_s14, 4   ;;  %s1551_s13 = smov %s1553_s15 }
 0x1b0   :  { %12 = sbr.rel (!%p10_p5) target bundleno = 2 (0x2), region = 76 }

</bundles_post_ra>
